<compile_context>
chip_gen: v5e
topology: v5e:2x2
jax: 0.10.0
libtpu: 0.0.40
codegen_flags: <defaults>
</compile_context>

<pallas_src>
import functools

import jax
import jax.numpy as jnp
from jax import lax
from jax.experimental import pallas as pl
from jax.experimental.pallas import tpu as pltpu


def _ln_conv_kernel(x_ref, w_ref, bmap_ref, o_ref, *,
                    H, W, C_in, C_out, k, p, s, eps, NB):
    """One grid step: NB batch elements stacked along the sublane (row) axis."""
    H_out = (H + 2 * p - k) // s + 1
    W_out = (W + 2 * p - k) // s + 1
    WO = W_out * C_out

    x = x_ref[0].astype(jnp.float32)                       # (NB*H, C_in*W)

    # ---- LayerNorm over channels: two-pass stats, exact f32 (VPU only) ----
    planes = [x[:, c * W:(c + 1) * W] for c in range(C_in)]
    s1 = planes[0]
    for c in range(1, C_in):
        s1 = s1 + planes[c]
    mean = s1 * (1.0 / C_in)                               # (NB*H, W)
    mean_f = jnp.concatenate([mean] * C_in, axis=1)        # (NB*H, C_in*W)
    xc = x - mean_f
    cpl = [xc[:, c * W:(c + 1) * W] for c in range(C_in)]
    s2 = cpl[0] * cpl[0]
    for c in range(1, C_in):
        s2 = s2 + cpl[c] * cpl[c]
    var = s2 * (1.0 / C_in)
    inv = lax.rsqrt(var + eps)
    inv_f = jnp.concatenate([inv] * C_in, axis=1)
    xhat = xc * inv_f                                      # gamma/beta folded out

    # ---- fused convolution: ONE bf16 MXU matmul, f32 accumulate ----
    # P[h, kh*WO + wo*C_out + co] = sum_{ci,w} xhat[h, ci*W+w] * w_big[...]
    P = jnp.dot(xhat.astype(jnp.bfloat16), w_ref[...],
                preferred_element_type=jnp.float32)        # (NB*H, k*WO)

    # ---- register accumulation of the k vertical taps; single store ----
    bmap = bmap_ref[...]                                   # (H_out, WO) f32
    accs = []
    for b in range(NB):
        acc_b = bmap                                       # bias + conv(beta)
        for kh in range(k):
            # output rows ho with 0 <= ho*s + kh - p < H (rest is zero padding)
            ho_lo = max(0, -((kh - p) // s))
            ho_hi = min(H_out, (H - 1 + p - kh) // s + 1)
            if ho_hi <= ho_lo:
                continue
            n = ho_hi - ho_lo
            h_lo = ho_lo * s + kh - p
            r0 = b * H + h_lo
            if s == 1:
                blk = P[r0:r0 + n, kh * WO:(kh + 1) * WO]  # (n, WO) f32
            else:
                # TODO(synk): for stride>1 fold the stride into the weight
                # columns instead of a strided sublane slice (review item).
                blk = P[r0:r0 + (n - 1) * s + 1:s, kh * WO:(kh + 1) * WO]
            parts = []
            if ho_lo > 0:
                parts.append(jnp.zeros((ho_lo, WO), jnp.float32))
            parts.append(blk)
            if H_out - ho_hi > 0:
                parts.append(jnp.zeros((H_out - ho_hi, WO), jnp.float32))
            tap = parts[0] if len(parts) == 1 else jnp.concatenate(parts, axis=0)
            acc_b = acc_b + tap
        accs.append(acc_b)
    acc = accs[0] if NB == 1 else jnp.concatenate(accs, axis=0)
    o_ref[0] = acc.astype(o_ref.dtype)                     # one lane-dense store


def layernorm_conv2d(x_nchw, gamma, beta, w_oihw, bias, *,
                     kernel_size, padding=0, stride=1, eps=1e-5):
    """Pallas implementation of LayerNormConv2d.forward.

    x_nchw : (N, C_in, H, W) float32
    gamma, beta : (C_in,) LayerNorm affine params
    w_oihw : (C_out, C_in, k, k) conv weight (PyTorch layout)
    bias : (C_out,) conv bias
    returns (N, C_out, H_out, W_out)
    """
    N, C_in, H, W = x_nchw.shape
    C_out = w_oihw.shape[0]
    k, p, s = kernel_size, padding, stride
    H_out = (H + 2 * p - k) // s + 1
    W_out = (W + 2 * p - k) // s + 1
    WO = W_out * C_out

    # Generation switch: v7x has 2 TensorCores/chip -> keep one batch element
    # per grid step so the "parallel" axis shards across cores; on single-TC
    # v5e/v6e fold the whole batch into one step (less fixed overhead, fuller
    # MXU M dimension).
    try:
        kind = jax.devices()[0].device_kind.lower()
    except Exception:  # pragma: no cover
        kind = ""
    NB = 1 if "v7" in kind else N
    n_steps = N // NB

    # ---- wrapper-side layout glue (plain JAX, done once per call) ----
    x_flat = jnp.transpose(x_nchw, (0, 2, 1, 3)).reshape(
        n_steps, NB * H, C_in * W).astype(jnp.float32)

    # ---- parameter folding (plain JAX, done once) ----
    # gamma folded into the conv weight (per input-channel scale of rows)
    w_eff = w_oihw.astype(jnp.float32) * gamma.astype(jnp.float32)[None, :, None, None]
    #   w_big[ci*W + w, kh*WO + wo*C_out + co] = w_eff[co, ci, kh, w + p - wo*s]
    # (zero where the kw tap is out of range -> horizontal padding folded in)
    w_k = jnp.transpose(w_eff, (2, 3, 1, 0))                        # (kh,kw,ci,co)
    kw_idx = jnp.arange(W)[:, None] + p - jnp.arange(W_out)[None, :] * s
    valid = (kw_idx >= 0) & (kw_idx < k)                            # (W, W_out)
    g = w_k[:, jnp.clip(kw_idx, 0, k - 1), :, :]                    # (kh,W,Wo,ci,co)
    g = jnp.where(valid[None, :, :, None, None], g, 0.0)
    g = jnp.transpose(g, (3, 1, 0, 2, 4))                           # (ci,W,kh,Wo,co)
    w_big = g.reshape(C_in * W, k * WO).astype(jnp.bfloat16)        # bf16 MXU operand

    # beta's conv contribution + conv bias -> exact f32 bias map (H_out, WO)
    beta_img = jnp.broadcast_to(
        beta.astype(jnp.float32).reshape(1, C_in, 1, 1), (1, C_in, H, W))
    beta_conv = lax.conv_general_dilated(
        beta_img, w_oihw.astype(jnp.float32),
        window_strides=(s, s), padding=((p, p), (p, p)),
        dimension_numbers=("NCHW", "OIHW", "NCHW"),
        precision=lax.Precision.HIGHEST)[0]                         # (C_out,Ho,Wo)
    bias_map = beta_conv + bias.astype(jnp.float32)[:, None, None]
    bias_map = jnp.transpose(bias_map, (1, 2, 0)).reshape(H_out, WO)

    kernel = functools.partial(_ln_conv_kernel, H=H, W=W, C_in=C_in,
                               C_out=C_out, k=k, p=p, s=s, eps=eps, NB=NB)

    out_flat = pl.pallas_call(
        kernel,
        out_shape=jax.ShapeDtypeStruct((n_steps, NB * H_out, WO), jnp.float32),
        grid=(n_steps,),
        in_specs=[
            pl.BlockSpec((1, NB * H, C_in * W), lambda b: (b, 0, 0)),
            pl.BlockSpec((C_in * W, k * WO), lambda b: (0, 0)),
            pl.BlockSpec((H_out, WO), lambda b: (0, 0)),
        ],
        out_specs=pl.BlockSpec((1, NB * H_out, WO), lambda b: (b, 0, 0)),
        compiler_params=pltpu.CompilerParams(
            dimension_semantics=("parallel",)),
    )(x_flat, w_big, bias_map)

    # unfold lanes (wo, co) and return NCHW
    out = out_flat.reshape(N, H_out, W_out, C_out)
    return jnp.transpose(out, (0, 3, 1, 2)).astype(x_nchw.dtype)


def _reference(x_nchw, gamma, beta, w_oihw, bias, *, padding, stride, eps=1e-5):
    # Pure-JAX f32 reference matching the PyTorch module semantics.
    xt = jnp.transpose(x_nchw, (0, 2, 3, 1))
    mean = xt.mean(-1, keepdims=True)
    var = ((xt - mean) ** 2).mean(-1, keepdims=True)
    xn = (xt - mean) / jnp.sqrt(var + eps) * gamma + beta
    xn_nchw = jnp.transpose(xn, (0, 3, 1, 2))
    y = lax.conv_general_dilated(
        xn_nchw, w_oihw,
        window_strides=(stride, stride),
        padding=((padding, padding), (padding, padding)),
        dimension_numbers=("NCHW", "OIHW", "NCHW"),
        precision=lax.Precision.HIGHEST)
    return y + bias[None, :, None, None]


if __name__ == "__main__":
    # Small shapes consistent with the module: N=2, C_in=4, H=W=16,
    # C_out=8, kernel_size=3, padding=1, stride=1.
    N, C_in, H, W = 2, 4, 16, 16
    C_out, ksize, pad, stride = 8, 3, 1, 1

    key = jax.random.PRNGKey(0)
    kx, kw, kb, kg, kbeta = jax.random.split(key, 5)

    x = jax.random.normal(kx, (N, C_in, H, W), dtype=jnp.float32)

    # Non-trivial LayerNorm affine params so the gamma/beta weight folding is
    # actually exercised (deterministic from PRNGKey(0) splits).
    gamma = 1.0 + 0.1 * jax.random.normal(kg, (C_in,), jnp.float32)
    beta = 0.1 * jax.random.normal(kbeta, (C_in,), jnp.float32)
    fan_in = C_in * ksize * ksize
    bound = 1.0 / (fan_in ** 0.5)
    conv_w = jax.random.uniform(kw, (C_out, C_in, ksize, ksize),
                                jnp.float32, minval=-bound, maxval=bound)
    conv_b = jax.random.uniform(kb, (C_out,), jnp.float32,
                                minval=-bound, maxval=bound)

    out = layernorm_conv2d(x, gamma, beta, conv_w, conv_b,
                           kernel_size=ksize, padding=pad, stride=stride)
    out = jax.block_until_ready(out)

    ref = _reference(x, gamma, beta, conv_w, conv_b, padding=pad, stride=stride)
    assert out.shape == (N, C_out, H, W), out.shape
    # Tolerance sized to the bf16 MXU-operand rounding bound:
    #   per-term <= 2*|w*gamma|max*|xhat|max*2^-9 ~= 1.3e-3, k*k*C_in = 36 terms
    #   -> worst-case abs error ~= 5e-2 (LayerNorm stats + beta path exact f32).
    max_diff = float(jnp.max(jnp.abs(out - ref)))
    assert jnp.allclose(out, ref, rtol=0.0, atol=5e-2), max_diff

    print("KERNEL_OK")
</pallas_src>

<mosaic_0001>
module attributes {stable_mosaic.version = 11 : i64} {
  func.func @_ln_conv_kernel(%arg0: i32, %arg1: memref<1x32x64xf32, #tpu.memory_space<vmem>>, %arg2: memref<64x384xbf16, #tpu.memory_space<vmem>>, %arg3: memref<16x128xf32, #tpu.memory_space<vmem>>, %arg4: memref<1x32x128xf32, #tpu.memory_space<vmem>>) attributes {dimension_semantics = [#tpu.dimension_semantics<parallel>], iteration_bounds = array<i64: 1>, scalar_prefetch = 0 : i64, scratch_operands = 0 : i64, tpu.core_type = #tpu.core_type<tc>, window_params = [{transform_indices = @transform_0, window_bounds = array<i64: 1, 32, 64>}, {pipeline_mode = #tpu.pipeline_mode<synchronous>, transform_indices = @transform_1, window_bounds = array<i64: 64, 384>}, {pipeline_mode = #tpu.pipeline_mode<synchronous>, transform_indices = @transform_2, window_bounds = array<i64: 16, 128>}, {transform_indices = @transform_3, window_bounds = array<i64: 1, 32, 128>}]} {
    %c0 = arith.constant 0 : index
    %c0_0 = arith.constant 0 : index
    %c0_1 = arith.constant 0 : index
    %0 = vector.load %arg1[%c0, %c0_0, %c0_1] : memref<1x32x64xf32, #tpu.memory_space<vmem>>, vector<1x32x64xf32>
    %1 = vector.shape_cast %0 : vector<1x32x64xf32> to vector<32x64xf32>
    %2 = vector.extract_strided_slice %1 {offsets = [0, 0], sizes = [32, 16], strides = [1, 1]} : vector<32x64xf32> to vector<32x16xf32>
    %3 = vector.extract_strided_slice %1 {offsets = [0, 16], sizes = [32, 16], strides = [1, 1]} : vector<32x64xf32> to vector<32x16xf32>
    %4 = vector.extract_strided_slice %1 {offsets = [0, 32], sizes = [32, 16], strides = [1, 1]} : vector<32x64xf32> to vector<32x16xf32>
    %5 = vector.extract_strided_slice %1 {offsets = [0, 48], sizes = [32, 16], strides = [1, 1]} : vector<32x64xf32> to vector<32x16xf32>
    %6 = arith.addf %2, %3 : vector<32x16xf32>
    %7 = arith.addf %6, %4 : vector<32x16xf32>
    %8 = arith.addf %7, %5 : vector<32x16xf32>
    %cst = arith.constant 2.500000e-01 : f32
    %9 = vector.broadcast %cst : f32 to vector<32x16xf32>
    %10 = arith.mulf %8, %9 : vector<32x16xf32>
    %11 = tpu.concatenate %10, %10, %10, %10 in 1 : vector<32x16xf32>, vector<32x16xf32>, vector<32x16xf32>, vector<32x16xf32> -> vector<32x64xf32>
    %12 = arith.subf %1, %11 : vector<32x64xf32>
    %13 = vector.extract_strided_slice %12 {offsets = [0, 0], sizes = [32, 16], strides = [1, 1]} : vector<32x64xf32> to vector<32x16xf32>
    %14 = vector.extract_strided_slice %12 {offsets = [0, 16], sizes = [32, 16], strides = [1, 1]} : vector<32x64xf32> to vector<32x16xf32>
    %15 = vector.extract_strided_slice %12 {offsets = [0, 32], sizes = [32, 16], strides = [1, 1]} : vector<32x64xf32> to vector<32x16xf32>
    %16 = vector.extract_strided_slice %12 {offsets = [0, 48], sizes = [32, 16], strides = [1, 1]} : vector<32x64xf32> to vector<32x16xf32>
    %17 = arith.mulf %13, %13 : vector<32x16xf32>
    %18 = arith.mulf %14, %14 : vector<32x16xf32>
    %19 = arith.addf %17, %18 : vector<32x16xf32>
    %20 = arith.mulf %15, %15 : vector<32x16xf32>
    %21 = arith.addf %19, %20 : vector<32x16xf32>
    %22 = arith.mulf %16, %16 : vector<32x16xf32>
    %23 = arith.addf %21, %22 : vector<32x16xf32>
    %cst_2 = arith.constant 2.500000e-01 : f32
    %24 = vector.broadcast %cst_2 : f32 to vector<32x16xf32>
    %25 = arith.mulf %23, %24 : vector<32x16xf32>
    %cst_3 = arith.constant 9.99999974E-6 : f32
    %26 = vector.broadcast %cst_3 : f32 to vector<32x16xf32>
    %27 = arith.addf %25, %26 : vector<32x16xf32>
    %28 = math.rsqrt %27 : vector<32x16xf32>
    %29 = tpu.concatenate %28, %28, %28, %28 in 1 : vector<32x16xf32>, vector<32x16xf32>, vector<32x16xf32>, vector<32x16xf32> -> vector<32x64xf32>
    %30 = arith.mulf %12, %29 : vector<32x64xf32>
    %31 = arith.truncf %30 : vector<32x64xf32> to vector<32x64xbf16>
    %c0_4 = arith.constant 0 : index
    %c0_5 = arith.constant 0 : index
    %32 = vector.load %arg2[%c0_4, %c0_5] : memref<64x384xbf16, #tpu.memory_space<vmem>>, vector<64x384xbf16>
    %cst_6 = arith.constant dense<0.000000e+00> : vector<32x384xf32>
    %33 = tpu.matmul %31, %32, %cst_6 {dimension_numbers = #tpu.dot_dimension_numbers<[1], [0], [0], [1], [0, 0, 1, 1], [], []>} : vector<32x64xbf16>, vector<64x384xbf16>, vector<32x384xf32> -> vector<32x384xf32>
    %c0_7 = arith.constant 0 : index
    %c0_8 = arith.constant 0 : index
    %34 = vector.load %arg3[%c0_7, %c0_8] : memref<16x128xf32, #tpu.memory_space<vmem>>, vector<16x128xf32>
    %35 = vector.extract_strided_slice %33 {offsets = [0, 0], sizes = [15, 128], strides = [1, 1]} : vector<32x384xf32> to vector<15x128xf32>
    %cst_9 = arith.constant 0.000000e+00 : f32
    %36 = vector.broadcast %cst_9 : f32 to vector<1x128xf32>
    %37 = tpu.concatenate %36, %35 in 0 : vector<1x128xf32>, vector<15x128xf32> -> vector<16x128xf32>
    %38 = arith.addf %34, %37 : vector<16x128xf32>
    %39 = vector.extract_strided_slice %33 {offsets = [0, 128], sizes = [16, 128], strides = [1, 1]} : vector<32x384xf32> to vector<16x128xf32>
    %40 = arith.addf %38, %39 : vector<16x128xf32>
    %41 = vector.extract_strided_slice %33 {offsets = [1, 256], sizes = [15, 128], strides = [1, 1]} : vector<32x384xf32> to vector<15x128xf32>
    %cst_10 = arith.constant 0.000000e+00 : f32
    %42 = vector.broadcast %cst_10 : f32 to vector<1x128xf32>
    %43 = tpu.concatenate %41, %42 in 0 : vector<15x128xf32>, vector<1x128xf32> -> vector<16x128xf32>
    %44 = arith.addf %40, %43 : vector<16x128xf32>
    %45 = vector.extract_strided_slice %33 {offsets = [16, 0], sizes = [15, 128], strides = [1, 1]} : vector<32x384xf32> to vector<15x128xf32>
    %cst_11 = arith.constant 0.000000e+00 : f32
    %46 = vector.broadcast %cst_11 : f32 to vector<1x128xf32>
    %47 = tpu.concatenate %46, %45 in 0 : vector<1x128xf32>, vector<15x128xf32> -> vector<16x128xf32>
    %48 = arith.addf %34, %47 : vector<16x128xf32>
    %49 = vector.extract_strided_slice %33 {offsets = [16, 128], sizes = [16, 128], strides = [1, 1]} : vector<32x384xf32> to vector<16x128xf32>
    %50 = arith.addf %48, %49 : vector<16x128xf32>
    %51 = vector.extract_strided_slice %33 {offsets = [17, 256], sizes = [15, 128], strides = [1, 1]} : vector<32x384xf32> to vector<15x128xf32>
    %cst_12 = arith.constant 0.000000e+00 : f32
    %52 = vector.broadcast %cst_12 : f32 to vector<1x128xf32>
    %53 = tpu.concatenate %51, %52 in 0 : vector<15x128xf32>, vector<1x128xf32> -> vector<16x128xf32>
    %54 = arith.addf %50, %53 : vector<16x128xf32>
    %55 = tpu.concatenate %44, %54 in 0 : vector<16x128xf32>, vector<16x128xf32> -> vector<32x128xf32>
    %c0_13 = arith.constant 0 : index
    %c0_14 = arith.constant 0 : index
    %c0_15 = arith.constant 0 : index
    %56 = vector.load %arg4[%c0_13, %c0_14, %c0_15] : memref<1x32x128xf32, #tpu.memory_space<vmem>>, vector<1x32x128xf32>
    %57 = vector.shape_cast %56 : vector<1x32x128xf32> to vector<32x128xf32>
    %58 = vector.shape_cast %55 : vector<32x128xf32> to vector<1x32x128xf32>
    tpu.vector_store %arg4[%c0_13, %c0_14, %c0_15], %58 {strides = array<i32>} : memref<1x32x128xf32, #tpu.memory_space<vmem>>, vector<1x32x128xf32>,
    return
  }
  func.func @transform_0(%arg0: i32) -> (i32, i32, i32) {
    %c0_i32 = arith.constant 0 : i32
    %c0_i32_0 = arith.constant 0 : i32
    %c0_i32_1 = arith.constant 0 : i32
    return %arg0, %c0_i32, %c0_i32_0 : i32, i32, i32
  }
  func.func @transform_1(%arg0: i32) -> (i32, i32) {
    %c0_i32 = arith.constant 0 : i32
    %c0_i32_0 = arith.constant 0 : i32
    %c0_i32_1 = arith.constant 0 : i32
    return %c0_i32, %c0_i32_0 : i32, i32
  }
  func.func @transform_2(%arg0: i32) -> (i32, i32) {
    %c0_i32 = arith.constant 0 : i32
    %c0_i32_0 = arith.constant 0 : i32
    %c0_i32_1 = arith.constant 0 : i32
    return %c0_i32, %c0_i32_0 : i32, i32
  }
  func.func @transform_3(%arg0: i32) -> (i32, i32, i32) {
    %c0_i32 = arith.constant 0 : i32
    %c0_i32_0 = arith.constant 0 : i32
    %c0_i32_1 = arith.constant 0 : i32
    return %arg0, %c0_i32, %c0_i32_0 : i32, i32, i32
  }
}

</mosaic_0001>

<bundles_post_ra>
// kernel: tpu_custom_call.1
= control target key start
LH: loop header
LB: loop body
LE: loop exit
PB: predicated region body
PF: predicated region fallthrough
CT: control target
= control target key end

     0   :  { %8 = vsyncpa [#allocation3], 0  ;;  %s967_s0 = inlined_call_operand.hbm [shape: f32[1,32,64], index: 0, kind: input, shape index: {}]   ;;  %s968_s1 = inlined_call_operand.hbm [shape: bf16[64,384], index: 1, kind: input, shape index: {}]   ;;  %s969_s2 = inlined_call_operand.hbm [shape: f32[16,128], index: 2, kind: input, shape index: {}]   ;;  %s970_s3 = inlined_call_operand.hbm [shape: f32[1,32,128], index: 3, kind: output, shape index: {}]  }
   0x1   :  { %9 = vsyncpa [#allocation6], 0  ;;  %s28_s14 = sshll.u32 %s968_s1, 4  ;;  %s29_s14 = int_to_ptr.hbm [resolvable:$true] %s28_s14 }
   0x2   :  { %10 = vsyncpa [#allocation4], 0  ;;  %s754_s15 = smov [#allocation5]   ;;  %s15_s19 = sshll.u32 %s967_s0, 4  ;;  %s16_s19 = int_to_ptr.hbm [resolvable:$true] %s15_s19 }
   0x3   :  { %s30_s16 = sshll.u32 %s754_s15, 4  ;;  %s755_s20 = smov 192   ;;  %s31_s16 = int_to_ptr.vmem [resolvable:$true] %s30_s16 }
   0x4   :  { %s756_s21 = smov 12   ;;  %s757_s22 = smov [#allocation2]  }
   0x5   :  { %36 = dma.hbm_to_vmem [thread:$0]  %s29_s14, 1536, %s31_s16, [#allocation6], %s755_s20, %s755_s20, %s756_s21  }
   0x6   :  { %s17_s23 = sshll.u32 %s757_s22, 4  ;;  %s758_s24 = smov 128   ;;  %s18_s23 = int_to_ptr.vmem [resolvable:$true] %s17_s23 }
   0x7   :  { %s759_s25 = smov 8   ;;  %s41_s27 = sshll.u32 %s969_s2, 4  ;;  %s42_s27 = int_to_ptr.hbm [resolvable:$true] %s41_s27 }
   0x8   :  { %23 = dma.hbm_to_vmem [thread:$0]  %s16_s19, 512, %s18_s23, [#allocation3], %s758_s24, %s758_s24, %s759_s25  }
   0x9   :  { %s760_s28 = smov [#allocation7]  }
   0xa   :  { %s43_s0 = sshll.u32 %s760_s28, 4  ;;  %s44_s0 = int_to_ptr.vmem [resolvable:$true] %s43_s0 }
   0xb   :  { %49 = dma.hbm_to_vmem [thread:$0]  %s42_s27, 256, %s44_s0, [#allocation6], %s758_s24, %s758_s24, %s759_s25  }
   0xc   :  { %748 = dma.done.wait [#allocation3], 512  }
   0xd   :  { %749 = vsyncadd [#allocation3], 4294966784 }
   0xe   :  { %750 = dma.done.wait [#allocation6], 1792  }
   0xf   :  { %751 = vsyncadd [#allocation6], 4294965504  ;;  %v803_v0 = vld [vmem:[#allocation2] sm:$0xff]  ;;  %s761_s29 = smov 96   ;;  %s762_s30 = smov 112   ;;  %v811_v1 = vld [vmem:[#allocation2 + $0x8] sm:$0xff] }
  0x10   :  { %87 = vrot.lane.b32.xlu1 %v803_v0, %s761_s29  ;;  %71 = vrot.lane.b32.xlu0 %v803_v0, %s762_s30  ;;  %s763_s2 = smov 80   ;;  %v819_v2 = vld [vmem:[#allocation2 + $0x18] sm:$0xff]  ;;  %v821_v3 = vld [vmem:[#allocation2 + $0x10] sm:$0xff]  ;;  %s764_s4 = smov 32   ;;  %vm163_vm0 = vcmask 130048   ;;  %vm173_vm1 = vcmask 392192  }
  0x11   :  { %103 = vrot.lane.b32.xlu2 %v803_v0, %s763_s2  ;;  %s765_s5 = smov 16   ;;  %s766_s6 = smov 48   ;;  %vm168_vm2 = vcmask 261120   ;;  %vm424_vm15 = vcmask 523264  }
  0x12   :  { %s767_s7 = smov [#allocation8]   ;;  %s546_s11 = sshll.u32 %s970_s3, 4  ;;  %s547_s11 = int_to_ptr.hbm [resolvable:$true] %s546_s11 }
  0x13   :  { %s544_s8 = sshll.u32 %s767_s7, 4  ;;  %s545_s8 = int_to_ptr.vmem [resolvable:$true] %s544_s8 }
  0x18   :  { %89 = vrot.lane.b32.xlu1 %v811_v1, %s761_s29  ;;  %73 = vrot.lane.b32.xlu0 %v811_v1, %s762_s30 }
  0x19   :  { %105 = vrot.lane.b32.xlu2 %v811_v1, %s763_s2 }
  0x20   :  { %77 = vrot.lane.b32.xlu1 %v819_v2, %s762_s30  ;;  %75 = vrot.lane.b32.xlu0 %v821_v3, %s762_s30 }
  0x21   :  { %91 = vrot.lane.b32.xlu2 %v821_v3, %s761_s29 }
  0x28   :  { %107 = vrot.lane.b32.xlu1 %v821_v3, %s763_s2  ;;  %93 = vrot.lane.b32.xlu0 %v819_v2, %s761_s29 }
  0x29   :  { %109 = vrot.lane.b32.xlu2 %v819_v2, %s763_s2 }
  0x6b   :  { %v104_v4 = vpop.permute.xlu2 %103 }
  0x73   :  { %v106_v10 = vpop.permute.xlu2 %105 }
  0x7b   :  { %v92_v18 = vpop.permute.xlu2 %91 }
  0x82   :  { %v88_v5 = vpop.permute.xlu1 %87  ;;  %v72_v6 = vpop.permute.xlu0 %71 }
  0x83   :  { %v83_v7 = vadd.f32 %v72_v6, %v803_v0  ;;  %v110_v28 = vpop.permute.xlu2 %109 }
  0x85   :  { %v99_v8 = vadd.f32 %v88_v5, %v83_v7 }
  0x87   :  { %v115_v9 = vadd.f32 %v104_v4, %v99_v8 }
  0x89   :  { %v119_v11 = vmul.f32 0.25, %v115_v9 }
  0x8a   :  { %v90_v12 = vpop.permute.xlu1 %89  ;;  %v74_v13 = vpop.permute.xlu0 %73 }
  0x8b   :  { %v84_v14 = vadd.f32 %v74_v13, %v811_v1  ;;  %139 = vrot.lane.b32.xlu2 %v119_v11, %s764_s4  ;;  %127 = vrot.lane.b32.xlu0 %v119_v11, %s765_s5 }
  0x8d   :  { %v100_v15 = vadd.f32 %v90_v12, %v84_v14 }
  0x8f   :  { %v116_v16 = vadd.f32 %v106_v10, %v100_v15 }
  0x91   :  { %v120_v17 = vmul.f32 0.25, %v116_v16 }
  0x92   :  { %v78_v19 = vpop.permute.xlu1 %77  ;;  %v76_v20 = vpop.permute.xlu0 %75 }
  0x93   :  { %153 = vrot.lane.b32.xlu2 %v120_v17, %s766_s6  ;;  %141 = vrot.lane.b32.xlu0 %v120_v17, %s764_s4  ;;  %v85_v21 = vadd.f32 %v76_v20, %v821_v3  ;;  %v86_v22 = vadd.f32 %v78_v19, %v819_v2 }
  0x94   :  { %129 = vrot.lane.b32.xlu1 %v120_v17, %s765_s5 }
  0x95   :  { %v101_v23 = vadd.f32 %v92_v18, %v85_v21 }
  0x9a   :  { %v108_v24 = vpop.permute.xlu1 %107  ;;  %v94_v25 = vpop.permute.xlu0 %93 }
  0x9b   :  { %v117_v26 = vadd.f32 %v108_v24, %v101_v23  ;;  %v102_v27 = vadd.f32 %v94_v25, %v86_v22 }
  0x9c   :  { %151 = vrot.lane.b32.xlu1 %v119_v11, %s766_s6 }
  0x9d   :  { %v121_v29 = vmul.f32 0.25, %v117_v26  ;;  %v118_v30 = vadd.f32 %v110_v28, %v102_v27 }
  0x9f   :  { %143 = vrot.lane.b32.xlu2 %v121_v29, %s764_s4  ;;  %131 = vrot.lane.b32.xlu0 %v121_v29, %s765_s5  ;;  %v122_v31 = vmul.f32 0.25, %v118_v30 }
  0xa4   :  { %133 = vrot.lane.b32.xlu1 %v122_v31, %s765_s5 }
  0xa7   :  { %157 = vrot.lane.b32.xlu2 %v122_v31, %s766_s6  ;;  %145 = vrot.lane.b32.xlu0 %v122_v31, %s764_s4 }
  0xac   :  { %155 = vrot.lane.b32.xlu1 %v121_v29, %s766_s6 }
  0xe5   :  { %v140_v33 = vpop.permute.xlu2 %139 }
  0xed   :  { %v154_v37 = vpop.permute.xlu2 %153 }
  0xf9   :  { %v144_v46 = vpop.permute.xlu2 %143 }
  0xfd   :  { %v128_v32 = vpop.permute.xlu0 %127 }
  0xfe   :  { %v164_v41 = vsel %vm163_vm0, %v119_v11, %v128_v32 }
  0xff   :  { %v169_v44 = vsel %vm168_vm2, %v164_v41, %v140_v33 }
 0x101   :  { %v158_v53 = vpop.permute.xlu2 %157 }
 0x105   :  { %v142_v34 = vpop.permute.xlu0 %141 }
 0x106   :  { %v130_v35 = vpop.permute.xlu1 %129 }
 0x107   :  { %v165_v36 = vsel %vm163_vm0, %v120_v17, %v130_v35 }
 0x108   :  { %v170_v38 = vsel %vm168_vm2, %v165_v36, %v142_v34 }
 0x109   :  { %v175_v39 = vsel %vm173_vm1, %v170_v38, %v154_v37 }
 0x10a   :  { %v855_v40 = vsub.f32 %v811_v1, %v175_v39 }
 0x10c   :  { %v183_v42 = vmul.f32 %v855_v40, %v855_v40 }
 0x10e   :  { %v152_v43 = vpop.permute.xlu1 %151  ;;  %192 = vrot.lane.b32.xlu1 %v183_v42, %s762_s30 }
 0x10f   :  { %v174_v45 = vsel %vm173_vm1, %v169_v44, %v152_v43 }
 0x110   :  { %v864_v47 = vsub.f32 %v803_v0, %v174_v45 }
 0x111   :  { %v132_v48 = vpop.permute.xlu0 %131 }
 0x112   :  { %v182_v49 = vmul.f32 %v864_v47, %v864_v47  ;;  %v166_v55 = vsel %vm163_vm0, %v121_v29, %v132_v48 }
 0x113   :  { %v171_v60 = vsel %vm168_vm2, %v166_v55, %v144_v46 }
 0x114   :  { %206 = vrot.lane.b32.xlu2 %v182_v49, %s761_s29  ;;  %190 = vrot.lane.b32.xlu0 %v182_v49, %s762_s30 }
 0x116   :  { %v134_v50 = vpop.permute.xlu1 %133  ;;  %222 = vrot.lane.b32.xlu1 %v182_v49, %s763_s2 }
 0x117   :  { %v167_v51 = vsel %vm163_vm0, %v122_v31, %v134_v50 }
 0x119   :  { %v146_v52 = vpop.permute.xlu0 %145 }
 0x11a   :  { %v172_v54 = vsel %vm168_vm2, %v167_v51, %v146_v52 }
 0x11b   :  { %v177_v56 = vsel %vm173_vm1, %v172_v54, %v158_v53 }
 0x11c   :  { %v876_v57 = vsub.f32 %v819_v2, %v177_v56  ;;  %224 = vrot.lane.b32.xlu2 %v183_v42, %s763_s2  ;;  %208 = vrot.lane.b32.xlu0 %v183_v42, %s761_s29 }
 0x11e   :  { %v185_v58 = vmul.f32 %v876_v57, %v876_v57  ;;  %v156_v59 = vpop.permute.xlu1 %155 }
 0x11f   :  { %v176_v61 = vsel %vm173_vm1, %v171_v60, %v156_v59 }
 0x120   :  { %v885_v62 = vsub.f32 %v821_v3, %v176_v61  ;;  %196 = vrot.lane.b32.xlu1 %v185_v58, %s762_s30 }
 0x122   :  { %v184_v63 = vmul.f32 %v885_v62, %v885_v62 }
 0x124   :  { %210 = vrot.lane.b32.xlu2 %v184_v63, %s761_s29  ;;  %194 = vrot.lane.b32.xlu0 %v184_v63, %s762_s30 }
 0x128   :  { %226 = vrot.lane.b32.xlu1 %v184_v63, %s763_s2 }
 0x12c   :  { %228 = vrot.lane.b32.xlu2 %v185_v58, %s763_s2  ;;  %212 = vrot.lane.b32.xlu0 %v185_v58, %s761_s29 }
 0x16e   :  { %v207_v1 = vpop.permute.xlu2 %206 }
 0x176   :  { %v225_v7 = vpop.permute.xlu2 %224 }
 0x17e   :  { %v211_v17 = vpop.permute.xlu2 %210 }
 0x180   :  { %v193_v0 = vpop.permute.xlu1 %192 }
 0x181   :  { %v203_v8 = vadd.f32 %v193_v0, %v183_v42  ;;  %v598_v0 = vld [vmem:[#allocation5 + $0x48] sm:$0xf] }
 0x186   :  { %v191_v2 = vpop.permute.xlu0 %190  ;;  %v229_v35 = vpop.permute.xlu2 %228 }
 0x187   :  { %v202_v3 = vadd.f32 %v191_v2, %v182_v49  ;;  %v623_v2 = vld [vmem:[#allocation5 + $0x4c] sm:$0xf] }
 0x188   :  { %v223_v5 = vpop.permute.xlu1 %222 }
 0x189   :  { %v218_v4 = vadd.f32 %v207_v1, %v202_v3  ;;  %v624_v1 = vld [vmem:[#allocation5 + $0x50] sm:$0xf0] }
 0x18a   :  { %v599_v3 = vor.u32 %v624_v1, %v598_v0 }
 0x18b   :  { %v234_v6 = vadd.f32 %v223_v5, %v218_v4  ;;  %v600_v4 = vld [vmem:[#allocation5 + $0x54] sm:$0xf0]  ;;  %v606_v5 = vld [vmem:[#allocation5 + $0x50] sm:$0xf] }
 0x18c   :  { %435 = vmatpush.bf16.msra.mxu0 %v599_v3  ;;  %626 = vmatpush.bf16.msra.mxu3 %v599_v3 }
 0x18d   :  { %v238_v9 = vmul.f32 0.25, %v234_v6  ;;  %v625_v6 = vld [vmem:[#allocation5 + $0x58] sm:$0xf0] }
 0x18e   :  { %v209_v10 = vpop.permute.xlu0 %208 }
 0x18f   :  { %v242_v11 = vadd.f32 1e-05, %v238_v9  ;;  %v219_v12 = vadd.f32 %v209_v10, %v203_v8  ;;  %v607_v8 = vor.u32 %v625_v6, %v606_v5  ;;  %v586_v9 = vld [vmem:[#allocation5 + $0x30] sm:$0xf]  ;;  %v621_v10 = vld [vmem:[#allocation5 + $0x38] sm:$0xf0] }
 0x191   :  { %644 = vrsqrt.f32 %v242_v11  ;;  %v235_v13 = vadd.f32 %v225_v7, %v219_v12  ;;  %vm252_vm4 = vweird.f32 %v242_v11  ;;  %v603_v7 = vor.u32 %v623_v2, %v600_v4  ;;  %473 = vmatpush.bf16.msra.mxu2 %v607_v8 }
 0x192   :  { %v197_v14 = vpop.permute.xlu1 %196  ;;  %v587_v12 = vor.u32 %v621_v10, %v586_v9 }
 0x193   :  { %v239_v15 = vmul.f32 0.25, %v235_v13  ;;  %v205_v28 = vadd.f32 %v197_v14, %v185_v58  ;;  %454 = vmatpush.bf16.msra.mxu1 %v603_v7  ;;  %v588_v13 = vld [vmem:[#allocation5 + $0x3c] sm:$0xf0]  ;;  %v594_v14 = vld [vmem:[#allocation5 + $0x38] sm:$0xf] }
 0x194   :  { %436 = vmatpush.bf16.msra.mxu0 %v587_v12  ;;  %627 = vmatpush.bf16.msra.mxu3 %v587_v12 }
 0x195   :  { %v243_v16 = vadd.f32 1e-05, %v239_v15  ;;  %v622_v15 = vld [vmem:[#allocation5 + $0x40] sm:$0xf0] }
 0x196   :  { %v195_v18 = vpop.permute.xlu0 %194 }
 0x197   :  { %v645_v19 = vpop.eup %644  ;;  %646 = vrsqrt.f32 %v243_v16  ;;  %v204_v20 = vadd.f32 %v195_v18, %v184_v63  ;;  %vm262_vm7 = vweird.f32 %v243_v16  ;;  %v574_v18 = vld [vmem:[#allocation5 + $0x18] sm:$0xf] }
 0x198   :  { %v247_v21 = vmul.f32 %v645_v19, %v242_v11  ;;  %vm253_vm3 = vweird.f32 %v645_v19  ;;  %v620_v11 = vld [vmem:[#allocation5 + $0x34] sm:$0xf] }
 0x199   :  { %v220_v22 = vadd.f32 %v211_v17, %v204_v20  ;;  %vm254_vm5 = vmor %vm252_vm4, %vm253_vm3  ;;  %v595_v17 = vor.u32 %v622_v15, %v594_v14  ;;  %v617_v20 = vld [vmem:[#allocation5 + $0x1c] sm:$0xf] }
 0x19a   :  { %v248_v23 = vmul.f32 %v645_v19, %v247_v21  ;;  %v227_v24 = vpop.permute.xlu1 %226 }
 0x19b   :  { %v236_v25 = vadd.f32 %v227_v24, %v220_v22  ;;  %474 = vmatpush.bf16.msra.mxu2 %v595_v17  ;;  %v576_v22 = vld [vmem:[#allocation5 + $0x24] sm:$0xf0]  ;;  %v619_v24 = vld [vmem:[#allocation5 + $0x28] sm:$0xf0] }
 0x19c   :  { %v249_v26 = vmul.f32 0.5, %v248_v23  ;;  %v582_v23 = vld [vmem:[#allocation5 + $0x20] sm:$0xf] }
 0x19d   :  { %v647_v27 = vpop.eup %646  ;;  %v240_v29 = vmul.f32 0.25, %v236_v25  ;;  %v579_v25 = vor.u32 %v617_v20, %v576_v22 }
 0x19e   :  { %v250_v30 = vsub.f32 1.5, %v249_v26  ;;  %v257_v31 = vmul.f32 %v647_v27, %v243_v16  ;;  %v213_v32 = vpop.permute.xlu0 %212  ;;  %vm263_vm6 = vweird.f32 %v647_v27  ;;  %v591_v16 = vor.u32 %v620_v11, %v588_v13  ;;  %v488_v11 = vld [vmem:[#allocation7] sm:$0xff] }
 0x19f   :  { %v244_v33 = vadd.f32 1e-05, %v240_v29  ;;  %v221_v34 = vadd.f32 %v213_v32, %v205_v28  ;;  %vm264_vm8 = vmor %vm262_vm7, %vm263_vm6  ;;  %v583_v26 = vor.u32 %v619_v24, %v582_v23  ;;  %v615_v28 = vld [vmem:[#allocation5 + $0x8] sm:$0xf0]  ;;  %v614_v29 = vld [vmem:[#allocation5 + $0x4] sm:$0xf] }
 0x1a0   :  { %v258_v36 = vmul.f32 %v647_v27, %v257_v31  ;;  %v251_v37 = vmul.f32 %v645_v19, %v250_v30  ;;  %455 = vmatpush.bf16.msra.mxu1 %v591_v16  ;;  %v564_v31 = vld [vmem:[#allocation5 + $0xc] sm:$0xf0]  ;;  %v570_v32 = vld [vmem:[#allocation5 + $0x8] sm:$0xf] }
 0x1a1   :  { %648 = vrsqrt.f32 %v244_v33  ;;  %v237_v38 = vadd.f32 %v229_v35, %v221_v34  ;;  %vm272_vm10 = vweird.f32 %v244_v33  ;;  %475 = vmatpush.bf16.msra.mxu2 %v583_v26  ;;  %v567_v34 = vor.u32 %v614_v29, %v564_v31 }
 0x1a2   :  { %v895_v39 = vsel %vm254_vm5, %v645_v19, %v251_v37  ;;  %v259_v41 = vmul.f32 0.5, %v258_v36  ;;  %v618_v19 = vld [vmem:[#allocation5 + $0x20] sm:$0xf0] }
 0x1a3   :  { %v241_v42 = vmul.f32 0.25, %v237_v38  ;;  %302 = vrot.lane.b32.xlu2 %v895_v39, %s764_s4  ;;  %290 = vrot.lane.b32.xlu0 %v895_v39, %s765_s5  ;;  %v575_v21 = vor.u32 %v618_v19, %v574_v18 }
 0x1a4   :  { %v260_v43 = vsub.f32 1.5, %v259_v41  ;;  %456 = vmatpush.bf16.msra.mxu1 %v579_v25 }
 0x1a5   :  { %v245_v44 = vadd.f32 1e-05, %v241_v42  ;;  %437 = vmatpush.bf16.msra.mxu0 %v575_v21  ;;  %628 = vmatpush.bf16.msra.mxu3 %v575_v21 }
 0x1a6   :  { %v261_v45 = vmul.f32 %v647_v27, %v260_v43 }
 0x1a7   :  { %v649_v46 = vpop.eup %648  ;;  %650 = vrsqrt.f32 %v245_v44  ;;  %vm282_vm13 = vweird.f32 %v245_v44 }
 0x1a8   :  { %v267_v48 = vmul.f32 %v649_v46, %v244_v33  ;;  %v901_v49 = vsel %vm264_vm8, %v647_v27, %v261_v45  ;;  %vm273_vm9 = vweird.f32 %v649_v46  ;;  %v562_v27 = vld [vmem:[#allocation5] sm:$0xf]  ;;  %v616_v33 = vld [vmem:[#allocation5 + $0x10] sm:$0xf0]  ;;  %457 = vmatpush.bf16.msra.mxu1 %v567_v34 }
 0x1a9   :  { %292 = vrot.lane.b32.xlu1 %v901_v49, %s765_s5  ;;  %vm274_vm11 = vmor %vm272_vm10, %vm273_vm9  ;;  %v563_v30 = vor.u32 %v615_v28, %v562_v27  ;;  %v571_v35 = vor.u32 %v616_v33, %v570_v32 }
 0x1aa   :  { %v268_v50 = vmul.f32 %v649_v46, %v267_v48 }
 0x1ab   :  { %316 = vrot.lane.b32.xlu2 %v901_v49, %s766_s6  ;;  %304 = vrot.lane.b32.xlu0 %v901_v49, %s764_s4 }
 0x1ac   :  { %v269_v51 = vmul.f32 0.5, %v268_v50  ;;  %438 = vmatpush.bf16.msra.mxu0 %v563_v30  ;;  %629 = vmatpush.bf16.msra.mxu3 %v563_v30 }
 0x1ad   :  { %v651_v52 = vpop.eup %650  ;;  %476 = vmatpush.bf16.msra.mxu2 %v571_v35 }
 0x1ae   :  { %v270_v53 = vsub.f32 1.5, %v269_v51  ;;  %v277_v54 = vmul.f32 %v651_v52, %v245_v44  ;;  %vm283_vm12 = vweird.f32 %v651_v52 }
 0x1af   :  { %vm284_vm14 = vmor %vm282_vm13, %vm283_vm12 }
 0x1b0   :  { %v278_v55 = vmul.f32 %v651_v52, %v277_v54  ;;  %v271_v56 = vmul.f32 %v649_v46, %v270_v53 }
 0x1b1   :  { %314 = vrot.lane.b32.xlu1 %v895_v39, %s766_s6 }
 0x1b2   :  { %v911_v58 = vsel %vm274_vm11, %v649_v46, %v271_v56  ;;  %v279_v59 = vmul.f32 0.5, %v278_v55 }
 0x1b3   :  { %306 = vrot.lane.b32.xlu2 %v911_v58, %s764_s4  ;;  %294 = vrot.lane.b32.xlu0 %v911_v58, %s765_s5 }
 0x1b4   :  { %v280_v60 = vsub.f32 1.5, %v279_v59 }
 0x1b6   :  { %v281_v61 = vmul.f32 %v651_v52, %v280_v60 }
 0x1b8   :  { %v917_v63 = vsel %vm284_vm14, %v651_v52, %v281_v61 }
 0x1b9   :  { %296 = vrot.lane.b32.xlu1 %v917_v63, %s765_s5 }
 0x1bb   :  { %320 = vrot.lane.b32.xlu2 %v917_v63, %s766_s6  ;;  %308 = vrot.lane.b32.xlu0 %v917_v63, %s764_s4 }
 0x1c1   :  { %318 = vrot.lane.b32.xlu1 %v911_v58, %s766_s6 }
 0x1fd   :  { %v303_v36 = vpop.permute.xlu2 %302 }
 0x205   :  { %v317_v42 = vpop.permute.xlu2 %316 }
 0x215   :  { %v291_v37 = vpop.permute.xlu0 %290 }
 0x216   :  { %v326_v45 = vsel %vm163_vm0, %v895_v39, %v291_v37 }
 0x217   :  { %v330_v50 = vsel %vm168_vm2, %v326_v45, %v303_v36 }
 0x21b   :  { %v293_v38 = vpop.permute.xlu1 %292 }
 0x21c   :  { %v327_v41 = vsel %vm163_vm0, %v901_v49, %v293_v38  ;;  %v307_v49 = vpop.permute.xlu2 %306 }
 0x21d   :  { %v305_v43 = vpop.permute.xlu0 %304 }
 0x21e   :  { %v331_v44 = vsel %vm168_vm2, %v327_v41, %v305_v43 }
 0x21f   :  { %v335_v46 = vsel %vm173_vm1, %v331_v44, %v317_v42 }
 0x220   :  { %v339_v52 = vmul.f32 %v335_v46, %v855_v40 }
 0x223   :  { %v315_v48 = vpop.permute.xlu1 %314 }
 0x224   :  { %v334_v51 = vsel %vm173_vm1, %v330_v50, %v315_v48 }
 0x225   :  { %v338_v53 = vmul.f32 %v334_v51, %v864_v47  ;;  %v295_v54 = vpop.permute.xlu0 %294  ;;  %v321_v47 = vpop.permute.xlu2 %320 }
 0x226   :  { %v328_v40 = vsel %vm163_vm0, %v911_v58, %v295_v54 }
 0x227   :  { %v342_v55 = vpack.c.bf16 %v339_v52, %v338_v53  ;;  %v332_v1 = vsel %vm168_vm2, %v328_v40, %v307_v49 }
 0x229   :  { %608 = vmatmul.msk.bf16.vlgmr.msra.gmra.mxu0 %vm424_vm15, %v342_v55  ;;  %610 = vmatmul.msk.bf16.vlgmr.msra.gmra.mxu1 %vm424_vm15, %v342_v55 }
 0x22a   :  { %612 = vmatmul.msk.bf16.vlgmr.msra.gmra.mxu2 %vm424_vm15, %v342_v55 }
 0x22b   :  { %v297_v39 = vpop.permute.xlu1 %296 }
 0x22c   :  { %v329_v59 = vsel %vm163_vm0, %v917_v63, %v297_v39  ;;  %vm492_vm0 = vcmask 1040384  }
 0x22d   :  { %v309_v56 = vpop.permute.xlu0 %308 }
 0x22e   :  { %v333_v60 = vsel %vm168_vm2, %v329_v59, %v309_v56 }
 0x22f   :  { %v337_v61 = vsel %vm173_vm1, %v333_v60, %v321_v47 }
 0x230   :  { %v341_v3 = vmul.f32 %v337_v61, %v876_v57  ;;  %v489_v57 = vld [vmem:[#allocation7 + $0x8] sm:$0xff] }
 0x233   :  { %v319_v0 = vpop.permute.xlu1 %318 }
 0x234   :  { %v336_v2 = vsel %vm173_vm1, %v332_v1, %v319_v0  ;;  %vm505_vm1 = vcmask 1046528  }
 0x235   :  { %v340_v4 = vmul.f32 %v336_v2, %v885_v62 }
 0x237   :  { %v343_v5 = vpack.c.bf16 %v341_v3, %v340_v4 }
 0x239   :  { %609 = vmatmul.msk.bf16.vlgmr.msra.gmra.mxu3 %vm424_vm15, %v343_v5  ;;  %611 = vmatmul.msk.bf16.gmra.mxu1 %vm424_vm15, %v343_v5 }
 0x23a   :  { %613 = vmatmul.msk.bf16.gmra.mxu2 %vm424_vm15, %v343_v5 }
 0x2a6   :  { %v440_v58 = vpop.f32.mrf.mxu0  ;;  %v459_v63 = vpop.f32.mrf.mxu1 }
 0x2a7   :  { %v493_v6 = vrot.slane %v440_v58, 7 }
 0x2a9   :  { %v498_v10 = vsel %vm492_vm0, 0.0, %v493_v6 }
 0x2aa   :  { %v499_v12 = vadd.f32 %v498_v10, %v488_v11 }
 0x2ac   :  { %v501_v18 = vadd.f32 %v499_v12, %v459_v63 }
 0x2ad   :  { %v478_v7 = vpop.f32.mrf.mxu2 }
 0x2ae   :  { %v442_v8 = vpop.f32.mrf.mxu0  ;;  %v461_v14 = vpop.f32.mrf.mxu1  ;;  %v506_v16 = vrot.slane %v478_v7, 1 }
 0x2af   :  { %v494_v9 = vrot.slane %v442_v8, 7 }
 0x2b1   :  { %v495_v62 = vsel %vm492_vm0, %v493_v6, %v494_v9 }
 0x2b2   :  { %v500_v13 = vadd.f32 %v495_v62, %v489_v57 }
 0x2b4   :  { %v502_v19 = vadd.f32 %v500_v13, %v461_v14 }
 0x2b5   :  { %v480_v15 = vpop.f32.mrf.mxu2 }
 0x2b6   :  { %v507_v17 = vrot.slane %v480_v15, 1  ;;  %v464_v27 = vpop.f32.mrf.mxu1 }
 0x2b8   :  { %v508_v20 = vsel %vm505_vm1, %v506_v16, %v507_v17  ;;  %v511_v21 = vsel %vm505_vm1, %v507_v17, 0.0 }
 0x2b9   :  { %v512_v22 = vadd.f32 %v508_v20, %v501_v18  ;;  %v513_v23 = vadd.f32 %v511_v21, %v502_v19 }
 0x2bb   :  { %536 = vst [vmem:[#allocation8] sm:$0xff] %v512_v22 }
 0x2bc   :  { %537 = vst [vmem:[#allocation8 + $0x8] sm:$0xff] %v513_v23  ;;  %v445_v24 = vpop.f32.mrf.mxu3 }
 0x2bd   :  { %v516_v25 = vrot.slane %v445_v24, 7  ;;  %v483_v26 = vpop.f32.mrf.mxu2 }
 0x2be   :  { %v528_v33 = vrot.slane %v483_v26, 1  ;;  %v466_v41 = vpop.f32.mrf.mxu1 }
 0x2bf   :  { %v521_v28 = vsel %vm492_vm0, 0.0, %v516_v25 }
 0x2c0   :  { %v522_v29 = vadd.f32 %v521_v28, %v488_v11 }
 0x2c2   :  { %v524_v35 = vadd.f32 %v522_v29, %v464_v27 }
 0x2c4   :  { %v447_v30 = vpop.f32.mrf.mxu3 }
 0x2c5   :  { %v517_v31 = vrot.slane %v447_v30, 7  ;;  %v485_v32 = vpop.f32.mrf.mxu2 }
 0x2c6   :  { %v529_v34 = vrot.slane %v485_v32, 1 }
 0x2c7   :  { %v518_v36 = vsel %vm492_vm0, %v516_v25, %v517_v31 }
 0x2c8   :  { %v523_v37 = vadd.f32 %v518_v36, %v489_v57  ;;  %v530_v38 = vsel %vm505_vm1, %v528_v33, %v529_v34  ;;  %v533_v44 = vsel %vm505_vm1, %v529_v34, 0.0 }
 0x2c9   :  { %v534_v42 = vadd.f32 %v530_v38, %v524_v35 }
 0x2ca   :  { %v525_v43 = vadd.f32 %v523_v37, %v466_v41 }
 0x2cb   :  { %538 = vst [vmem:[#allocation8 + $0x10] sm:$0xff] %v534_v42 }
 0x2cc   :  { %v535_v45 = vadd.f32 %v533_v44, %v525_v43 }
 0x2ce   :  { %539 = vst [vmem:[#allocation8 + $0x18] sm:$0xff] %v535_v45 }
 0x2cf   :  { %552 = dma.vmem_to_hbm [thread:$0]  %s545_s8, 512, %s547_s11, [#allocation4], %s758_s24, %s758_s24, %s759_s25  }
 0x2d0   :  { %752 = dma.done.wait [#allocation4], 512  }
 0x2d1   :  { %753 = vsyncadd [#allocation4], 4294966784 }
 0x2d2   :  { %557 = vsyncpa [#allocation3], 1 }
 0x2d3   :  { %558 = vsyncpa [#allocation6], 1 }
 0x2d4   :  { %559 = vsyncpa [#allocation4], 1 }

</bundles_post_ra>
